<compile_context>
chip_gen: v6e
topology: v6e:2x2x1
jax: 0.10.0
libtpu: 0.0.40
codegen_flags: <defaults>
</compile_context>

<pallas_src>
import jax
import jax.numpy as jnp
from jax.experimental import pallas as pl
from jax.experimental.pallas import tpu as pltpu


def _attention_kernel(emb_ref, batch_H_ref, hproj_ref,
                      w_h2h_ref, w_score_ref,
                      w_ih_x_ref, w_hh_ref,
                      w_gen_ref, b_gen_ref,
                      probs_ref,
                      h_sc, c_sc):
    B, T, D = batch_H_ref.shape
    Hp = h_sc.shape[1]
    step = pl.program_id(0)

    @pl.when(step == 0)
    def _init():
        h_sc[...] = jnp.zeros_like(h_sc)
        c_sc[...] = jnp.zeros_like(c_sc)

    h_prev = h_sc[...]
    c_prev = c_sc[...]

    # --- attention scores: e = score(tanh(i2h(batch_H) + h2h(h_prev))) ---
    # h2h bias is already folded into hproj (wrapper), so this is bias-free.
    hh = jnp.dot(h_prev, w_h2h_ref[...], preferred_element_type=jnp.float32)    # [B, Hp]
    tanh_out = jnp.tanh(hproj_ref[...] + hh[:, None, :])                        # [B, T, Hp]
    # score projection: VPU multiply + lane reduce instead of an N=1 MXU matmul
    e = jnp.sum(tanh_out * w_score_ref[...][None, :, :], axis=-1)               # [B, T]

    # --- softmax over the T (encoder step) axis: one divide per row ---
    m = jnp.max(e, axis=1, keepdims=True)
    p = jnp.exp(e - m)
    inv_l = 1.0 / jnp.sum(p, axis=1, keepdims=True)                             # [B, 1]
    alpha = p * inv_l                                                           # [B, T]

    # --- context = alpha^T @ batch_H (per-batch weighted sum) ---
    context = jnp.sum(alpha[:, :, None] * batch_H_ref[...], axis=1)             # [B, D]

    # --- LSTMCell on [context, onehot]; onehot@w_ih_e + b_ih + b_hh pre-gathered ---
    gates = (jnp.dot(context, w_ih_x_ref[...], preferred_element_type=jnp.float32)
             + jnp.dot(h_prev, w_hh_ref[...], preferred_element_type=jnp.float32)
             + emb_ref[0])                                                      # [B, 4*Hp]
    i_g = jax.nn.sigmoid(gates[:, 0 * Hp:1 * Hp])
    f_g = jax.nn.sigmoid(gates[:, 1 * Hp:2 * Hp])
    g_g = jnp.tanh(gates[:, 2 * Hp:3 * Hp])
    o_g = jax.nn.sigmoid(gates[:, 3 * Hp:4 * Hp])
    c_new = f_g * c_prev + i_g * g_g
    h_new = o_g * jnp.tanh(c_new)

    h_sc[...] = h_new
    c_sc[...] = c_new

    # --- generator: lane-dense (padded-C) store ---
    probs_ref[0] = (jnp.dot(h_new, w_gen_ref[...], preferred_element_type=jnp.float32)
                    + b_gen_ref[...])


def _round_up(x, m):
    return ((x + m - 1) // m) * m


def attention_forward(params, batch_H, text, batch_max_length):
    """Training-mode forward of the PyTorch `Attention` module."""
    B, T, D = batch_H.shape
    H = params["w_h2h"].shape[0]
    C = params["w_gen"].shape[0]
    S = batch_max_length + 1                                  # num_steps

    Hp = _round_up(H, 128)
    Cp = _round_up(C, 128)
    dH = Hp - H
    f32 = jnp.float32
    batch_H = batch_H.astype(f32)

    # --- glue: pad / transpose / split weights so the kernel does plain x @ W ---
    def pad2(x, rows, cols):
        return jnp.pad(x, ((0, rows - x.shape[0]), (0, cols - x.shape[1])))

    def pad_gate_cols(w):        # [X, 4H] -> [X, 4*Hp], zero pad inside each gate block
        X = w.shape[0]
        return jnp.pad(w.reshape(X, 4, H), ((0, 0), (0, 0), (0, dH))).reshape(X, 4 * Hp)

    w_i2h_t = pad2(params["w_i2h"].T, D, Hp)                          # [D, Hp]
    w_h2h_t = pad2(params["w_h2h"].T, Hp, Hp)                         # [Hp, Hp]
    b_h2h = jnp.pad(params["b_h2h"], (0, dH))                         # [Hp]
    w_score = jnp.pad(params["w_score"], ((0, 0), (0, dH)))           # [1, Hp]
    w_ih_x_t = pad_gate_cols(params["w_ih"][:, :D].T)                 # [D, 4*Hp]
    w_ih_e_t = pad_gate_cols(params["w_ih"][:, D:].T)                 # [C, 4*Hp]
    w_hh_t = jnp.pad(pad_gate_cols(params["w_hh"].T), ((0, dH), (0, 0)))  # [Hp, 4*Hp]
    b_gates = pad_gate_cols((params["b_ih"] + params["b_hh"]).reshape(1, 4 * H))  # [1, 4*Hp]
    w_gen_t = pad2(params["w_gen"].T, Hp, Cp)                         # [Hp, Cp]
    b_gen = jnp.pad(params["b_gen"], (0, Cp - C)).reshape(1, Cp)      # [1, Cp]

    # step-invariant encoder projection (h2h bias folded in), computed once by XLA
    hproj = (jnp.einsum("btd,dh->bth", batch_H, w_i2h_t) + b_h2h[None, None, :]).astype(f32)

    # teacher-forcing rows: one_hot(text) @ w_ih_e^T is a row gather; biases folded in
    emb = jnp.transpose(w_ih_e_t[text[:, :S]] + b_gates, (1, 0, 2)).astype(f32)  # [S, B, 4*Hp]

    # step-invariant inputs: resident in VMEM, single-buffered
    def resident_spec(shape):
        return pl.BlockSpec(shape, lambda i: (0,) * len(shape),
                            pipeline_mode=pl.Buffered(1))

    grid_spec = pltpu.PrefetchScalarGridSpec(
        num_scalar_prefetch=0,
        grid=(S,),
        in_specs=[
            pl.BlockSpec((1, B, 4 * Hp), lambda i: (i, 0, 0)),        # emb (per step)
            resident_spec((B, T, D)),                                 # batch_H
            resident_spec((B, T, Hp)),                                # hproj
            resident_spec((Hp, Hp)),                                  # w_h2h
            resident_spec((1, Hp)),                                   # w_score
            resident_spec((D, 4 * Hp)),                               # w_ih_x
            resident_spec((Hp, 4 * Hp)),                              # w_hh
            resident_spec((Hp, Cp)),                                  # w_gen
            resident_spec((1, Cp)),                                   # b_gen
        ],
        out_specs=pl.BlockSpec((1, B, Cp), lambda i: (i, 0, 0)),
        scratch_shapes=[
            pltpu.VMEM((B, Hp), f32),       # h
            pltpu.VMEM((B, Hp), f32),       # c
        ],
    )

    # explicit VMEM budget: resident set + double-buffered streamed blocks + scratch
    itemsize = 4
    resident_bytes = itemsize * (batch_H.size + hproj.size + w_h2h_t.size + w_score.size
                                 + w_ih_x_t.size + w_hh_t.size + w_gen_t.size + b_gen.size)
    streamed_bytes = itemsize * 2 * (B * 4 * Hp + B * Cp)
    scratch_bytes = itemsize * 2 * B * Hp
    vmem_limit = min(128 * 1024 * 1024,
                     int(1.5 * (resident_bytes + streamed_bytes + scratch_bytes)) + (4 << 20))

    probs_padded = pl.pallas_call(
        _attention_kernel,
        out_shape=jax.ShapeDtypeStruct((S, B, Cp), f32),
        grid_spec=grid_spec,
        compiler_params=pltpu.CompilerParams(
            dimension_semantics=("arbitrary",),
            vmem_limit_bytes=vmem_limit),
    )(emb, batch_H, hproj,
      w_h2h_t, w_score, w_ih_x_t, w_hh_t, w_gen_t, b_gen)

    # strip class padding and restore module layout [B, S, C] (single fused XLA copy)
    return jnp.transpose(probs_padded[:, :, :C], (1, 0, 2))


def attention_forward_ref(params, batch_H, text, batch_max_length):
    """Pure-JAX reference mirroring the PyTorch module (is_train=True)."""
    B, T, D = batch_H.shape
    H = params["w_h2h"].shape[0]
    C = params["w_gen"].shape[0]
    S = batch_max_length + 1
    h = jnp.zeros((B, H), jnp.float32)
    c = jnp.zeros((B, H), jnp.float32)
    outs = []
    bH_proj = batch_H @ params["w_i2h"].T
    for i in range(S):
        onehot = jax.nn.one_hot(text[:, i], C, dtype=jnp.float32)
        hp = h @ params["w_h2h"].T + params["b_h2h"]
        e = jnp.tanh(bH_proj + hp[:, None, :]) @ params["w_score"].T  # [B,T,1]
        alpha = jax.nn.softmax(e, axis=1)
        context = jnp.sum(alpha * batch_H, axis=1)
        x = jnp.concatenate([context, onehot], axis=1)
        gates = x @ params["w_ih"].T + params["b_ih"] + h @ params["w_hh"].T + params["b_hh"]
        i_g, f_g, g_g, o_g = jnp.split(gates, 4, axis=1)
        c = jax.nn.sigmoid(f_g) * c + jax.nn.sigmoid(i_g) * jnp.tanh(g_g)
        h = jax.nn.sigmoid(o_g) * jnp.tanh(c)
        outs.append(h)
    hiddens = jnp.stack(outs, axis=1)                          # [B, S, H]
    return hiddens @ params["w_gen"].T + params["b_gen"]


def init_params(key, input_size, hidden_size, num_classes):
    ks = jax.random.split(key, 10)
    s = 0.1
    H, D, C = hidden_size, input_size, num_classes
    return {
        "w_i2h": s * jax.random.normal(ks[0], (H, D), jnp.float32),
        "w_h2h": s * jax.random.normal(ks[1], (H, H), jnp.float32),
        "b_h2h": s * jax.random.normal(ks[2], (H,), jnp.float32),
        "w_score": s * jax.random.normal(ks[3], (1, H), jnp.float32),
        "w_ih": s * jax.random.normal(ks[4], (4 * H, D + C), jnp.float32),
        "b_ih": s * jax.random.normal(ks[5], (4 * H,), jnp.float32),
        "w_hh": s * jax.random.normal(ks[6], (4 * H, H), jnp.float32),
        "b_hh": s * jax.random.normal(ks[7], (4 * H,), jnp.float32),
        "w_gen": s * jax.random.normal(ks[8], (C, H), jnp.float32),
        "b_gen": s * jax.random.normal(ks[9], (C,), jnp.float32),
    }


if __name__ == "__main__":
    B, T, D, H, C = 2, 8, 32, 32, 16
    batch_max_length = 7                     # num_steps = 8
    key = jax.random.PRNGKey(0)
    kp, kh, kt = jax.random.split(key, 3)

    params = init_params(kp, D, H, C)
    batch_H = jax.random.normal(kh, (B, T, D), jnp.float32)
    text = jax.random.randint(kt, (B, batch_max_length + 1), 0, C, jnp.int32)

    probs = attention_forward(params, batch_H, text, batch_max_length)
    probs = jax.block_until_ready(probs)

    ref = attention_forward_ref(params, batch_H, text, batch_max_length)
    assert probs.shape == (B, batch_max_length + 1, C)
    assert jnp.allclose(probs, ref, atol=1e-4, rtol=1e-4), float(
        jnp.max(jnp.abs(probs - ref)))

    print("KERNEL_OK")
</pallas_src>

<mosaic_0001>
module attributes {stable_mosaic.version = 11 : i64} {
  func.func @_attention_kernel(%arg0: i32, %arg1: memref<1x2x512xf32, #tpu.memory_space<vmem>>, %arg2: memref<2x8x32xf32, #tpu.memory_space<vmem>>, %arg3: memref<2x8x128xf32, #tpu.memory_space<vmem>>, %arg4: memref<128x128xf32, #tpu.memory_space<vmem>>, %arg5: memref<1x128xf32, #tpu.memory_space<vmem>>, %arg6: memref<32x512xf32, #tpu.memory_space<vmem>>, %arg7: memref<128x512xf32, #tpu.memory_space<vmem>>, %arg8: memref<128x128xf32, #tpu.memory_space<vmem>>, %arg9: memref<1x128xf32, #tpu.memory_space<vmem>>, %arg10: memref<1x2x128xf32, #tpu.memory_space<vmem>>, %arg11: memref<2x128xf32, #tpu.memory_space<vmem>>, %arg12: memref<2x128xf32, #tpu.memory_space<vmem>>) attributes {dimension_semantics = [#tpu.dimension_semantics<arbitrary>], iteration_bounds = array<i64: 8>, scalar_prefetch = 0 : i64, scratch_operands = 2 : i64, tpu.core_type = #tpu.core_type<tc>, window_params = [{transform_indices = @transform_0, window_bounds = array<i64: 1, 2, 512>}, {pipeline_mode = #tpu.pipeline_mode<synchronous>, transform_indices = @transform_1, window_bounds = array<i64: 2, 8, 32>}, {pipeline_mode = #tpu.pipeline_mode<synchronous>, transform_indices = @transform_2, window_bounds = array<i64: 2, 8, 128>}, {pipeline_mode = #tpu.pipeline_mode<synchronous>, transform_indices = @transform_3, window_bounds = array<i64: 128, 128>}, {pipeline_mode = #tpu.pipeline_mode<synchronous>, transform_indices = @transform_4, window_bounds = array<i64: 1, 128>}, {pipeline_mode = #tpu.pipeline_mode<synchronous>, transform_indices = @transform_5, window_bounds = array<i64: 32, 512>}, {pipeline_mode = #tpu.pipeline_mode<synchronous>, transform_indices = @transform_6, window_bounds = array<i64: 128, 512>}, {pipeline_mode = #tpu.pipeline_mode<synchronous>, transform_indices = @transform_7, window_bounds = array<i64: 128, 128>}, {pipeline_mode = #tpu.pipeline_mode<synchronous>, transform_indices = @transform_8, window_bounds = array<i64: 1, 128>}, {transform_indices = @transform_9, window_bounds = array<i64: 1, 2, 128>}]} {
    %c0_i32 = arith.constant 0 : i32
    %0 = arith.cmpi eq, %arg0, %c0_i32 : i32
    %1 = arith.extui %0 : i1 to i32
    %c0_i32_0 = arith.constant 0 : i32
    %2 = arith.cmpi ne, %1, %c0_i32_0 : i32
    scf.if %2 {
      %cst_43 = arith.constant 0.000000e+00 : f32
      %76 = vector.broadcast %cst_43 : f32 to vector<2x128xf32>
      %c0_44 = arith.constant 0 : index
      %c0_45 = arith.constant 0 : index
      %77 = vector.load %arg11[%c0_44, %c0_45] : memref<2x128xf32, #tpu.memory_space<vmem>>, vector<2x128xf32>
      tpu.vector_store %arg11[%c0_44, %c0_45], %76 {strides = array<i32>} : memref<2x128xf32, #tpu.memory_space<vmem>>, vector<2x128xf32>,
      %cst_46 = arith.constant 0.000000e+00 : f32
      %78 = vector.broadcast %cst_46 : f32 to vector<2x128xf32>
      %c0_47 = arith.constant 0 : index
      %c0_48 = arith.constant 0 : index
      %79 = vector.load %arg12[%c0_47, %c0_48] : memref<2x128xf32, #tpu.memory_space<vmem>>, vector<2x128xf32>
      tpu.vector_store %arg12[%c0_47, %c0_48], %78 {strides = array<i32>} : memref<2x128xf32, #tpu.memory_space<vmem>>, vector<2x128xf32>,
    } else {
    }
    %c0 = arith.constant 0 : index
    %c0_1 = arith.constant 0 : index
    %3 = vector.load %arg11[%c0, %c0_1] : memref<2x128xf32, #tpu.memory_space<vmem>>, vector<2x128xf32>
    %c0_2 = arith.constant 0 : index
    %c0_3 = arith.constant 0 : index
    %4 = vector.load %arg12[%c0_2, %c0_3] : memref<2x128xf32, #tpu.memory_space<vmem>>, vector<2x128xf32>
    %c0_4 = arith.constant 0 : index
    %c0_5 = arith.constant 0 : index
    %5 = vector.load %arg4[%c0_4, %c0_5] : memref<128x128xf32, #tpu.memory_space<vmem>>, vector<128x128xf32>
    %cst = arith.constant dense<0.000000e+00> : vector<2x128xf32>
    %6 = tpu.matmul %3, %5, %cst {dimension_numbers = #tpu.dot_dimension_numbers<[1], [0], [0], [1], [0, 0, 1, 1], [], []>} : vector<2x128xf32>, vector<128x128xf32>, vector<2x128xf32> -> vector<2x128xf32>
    %c0_6 = arith.constant 0 : index
    %c0_7 = arith.constant 0 : index
    %c0_8 = arith.constant 0 : index
    %7 = vector.load %arg3[%c0_6, %c0_7, %c0_8] : memref<2x8x128xf32, #tpu.memory_space<vmem>>, vector<2x8x128xf32>
    %8 = vector.shape_cast %6 : vector<2x128xf32> to vector<2x1x128xf32>
    %9 = vector.broadcast %8 : vector<2x1x128xf32> to vector<2x8x128xf32>
    %10 = arith.addf %7, %9 : vector<2x8x128xf32>
    %11 = math.tanh %10 : vector<2x8x128xf32>
    %c0_9 = arith.constant 0 : index
    %c0_10 = arith.constant 0 : index
    %12 = vector.load %arg5[%c0_9, %c0_10] : memref<1x128xf32, #tpu.memory_space<vmem>>, vector<1x128xf32>
    %13 = vector.shape_cast %12 : vector<1x128xf32> to vector<1x1x128xf32>
    %14 = vector.broadcast %13 : vector<1x1x128xf32> to vector<2x8x128xf32>
    %15 = arith.mulf %11, %14 : vector<2x8x128xf32>
    %cst_11 = arith.constant dense<0.000000e+00> : vector<2x8xf32>
    %16 = vector.multi_reduction <add>, %15, %cst_11 [2] : vector<2x8x128xf32> to vector<2x8xf32>
    %cst_12 = arith.constant dense<0xFF800000> : vector<2xf32>
    %17 = vector.multi_reduction <maximumf>, %16, %cst_12 [1] : vector<2x8xf32> to vector<2xf32>
    %18 = vector.shape_cast %17 : vector<2xf32> to vector<2x1xf32>
    %19 = vector.broadcast %18 : vector<2x1xf32> to vector<2x8xf32>
    %20 = arith.subf %16, %19 : vector<2x8xf32>
    %21 = math.exp %20 : vector<2x8xf32>
    %cst_13 = arith.constant dense<0.000000e+00> : vector<2xf32>
    %22 = vector.multi_reduction <add>, %21, %cst_13 [1] : vector<2x8xf32> to vector<2xf32>
    %23 = vector.shape_cast %22 : vector<2xf32> to vector<2x1xf32>
    %cst_14 = arith.constant 1.000000e+00 : f32
    %24 = vector.broadcast %cst_14 : f32 to vector<2x1xf32>
    %25 = arith.divf %24, %23 : vector<2x1xf32>
    %26 = vector.broadcast %25 : vector<2x1xf32> to vector<2x8xf32>
    %27 = arith.mulf %21, %26 : vector<2x8xf32>
    %28 = vector.shape_cast %27 : vector<2x8xf32> to vector<2x8x1xf32>
    %c0_15 = arith.constant 0 : index
    %c0_16 = arith.constant 0 : index
    %c0_17 = arith.constant 0 : index
    %29 = vector.load %arg2[%c0_15, %c0_16, %c0_17] : memref<2x8x32xf32, #tpu.memory_space<vmem>>, vector<2x8x32xf32>
    %30 = vector.broadcast %28 : vector<2x8x1xf32> to vector<2x8x32xf32>
    %31 = arith.mulf %30, %29 : vector<2x8x32xf32>
    %cst_18 = arith.constant dense<0.000000e+00> : vector<2x32xf32>
    %32 = vector.multi_reduction <add>, %31, %cst_18 [1] : vector<2x8x32xf32> to vector<2x32xf32>
    %c0_19 = arith.constant 0 : index
    %c0_20 = arith.constant 0 : index
    %33 = vector.load %arg6[%c0_19, %c0_20] : memref<32x512xf32, #tpu.memory_space<vmem>>, vector<32x512xf32>
    %cst_21 = arith.constant dense<0.000000e+00> : vector<2x512xf32>
    %34 = tpu.matmul %32, %33, %cst_21 {dimension_numbers = #tpu.dot_dimension_numbers<[1], [0], [0], [1], [0, 0, 1, 1], [], []>} : vector<2x32xf32>, vector<32x512xf32>, vector<2x512xf32> -> vector<2x512xf32>
    %c0_22 = arith.constant 0 : index
    %c0_23 = arith.constant 0 : index
    %35 = vector.load %arg7[%c0_22, %c0_23] : memref<128x512xf32, #tpu.memory_space<vmem>>, vector<128x512xf32>
    %cst_24 = arith.constant dense<0.000000e+00> : vector<2x512xf32>
    %36 = tpu.matmul %3, %35, %cst_24 {dimension_numbers = #tpu.dot_dimension_numbers<[1], [0], [0], [1], [0, 0, 1, 1], [], []>} : vector<2x128xf32>, vector<128x512xf32>, vector<2x512xf32> -> vector<2x512xf32>
    %37 = arith.addf %34, %36 : vector<2x512xf32>
    %c0_25 = arith.constant 0 : index
    %c0_26 = arith.constant 0 : index
    %c0_27 = arith.constant 0 : index
    %38 = vector.load %arg1[%c0_25, %c0_26, %c0_27] : memref<1x2x512xf32, #tpu.memory_space<vmem>>, vector<1x2x512xf32>
    %39 = vector.shape_cast %38 : vector<1x2x512xf32> to vector<2x512xf32>
    %40 = arith.addf %37, %39 : vector<2x512xf32>
    %41 = vector.extract_strided_slice %40 {offsets = [0, 0], sizes = [2, 128], strides = [1, 1]} : vector<2x512xf32> to vector<2x128xf32>
    %42 = arith.negf %41 : vector<2x128xf32>
    %43 = math.exp %42 : vector<2x128xf32>
    %cst_28 = arith.constant 1.000000e+00 : f32
    %44 = vector.broadcast %cst_28 : f32 to vector<2x128xf32>
    %45 = arith.addf %44, %43 : vector<2x128xf32>
    %46 = arith.divf %44, %45 : vector<2x128xf32>
    %47 = vector.extract_strided_slice %40 {offsets = [0, 128], sizes = [2, 128], strides = [1, 1]} : vector<2x512xf32> to vector<2x128xf32>
    %48 = arith.negf %47 : vector<2x128xf32>
    %49 = math.exp %48 : vector<2x128xf32>
    %cst_29 = arith.constant 1.000000e+00 : f32
    %50 = vector.broadcast %cst_29 : f32 to vector<2x128xf32>
    %51 = arith.addf %50, %49 : vector<2x128xf32>
    %52 = arith.divf %50, %51 : vector<2x128xf32>
    %53 = vector.extract_strided_slice %40 {offsets = [0, 256], sizes = [2, 128], strides = [1, 1]} : vector<2x512xf32> to vector<2x128xf32>
    %54 = math.tanh %53 : vector<2x128xf32>
    %55 = vector.extract_strided_slice %40 {offsets = [0, 384], sizes = [2, 128], strides = [1, 1]} : vector<2x512xf32> to vector<2x128xf32>
    %56 = arith.negf %55 : vector<2x128xf32>
    %57 = math.exp %56 : vector<2x128xf32>
    %cst_30 = arith.constant 1.000000e+00 : f32
    %58 = vector.broadcast %cst_30 : f32 to vector<2x128xf32>
    %59 = arith.addf %58, %57 : vector<2x128xf32>
    %60 = arith.divf %58, %59 : vector<2x128xf32>
    %61 = arith.mulf %52, %4 : vector<2x128xf32>
    %62 = arith.mulf %46, %54 : vector<2x128xf32>
    %63 = arith.addf %61, %62 : vector<2x128xf32>
    %64 = math.tanh %63 : vector<2x128xf32>
    %65 = arith.mulf %60, %64 : vector<2x128xf32>
    %c0_31 = arith.constant 0 : index
    %c0_32 = arith.constant 0 : index
    %66 = vector.load %arg11[%c0_31, %c0_32] : memref<2x128xf32, #tpu.memory_space<vmem>>, vector<2x128xf32>
    tpu.vector_store %arg11[%c0_31, %c0_32], %65 {strides = array<i32>} : memref<2x128xf32, #tpu.memory_space<vmem>>, vector<2x128xf32>,
    %c0_33 = arith.constant 0 : index
    %c0_34 = arith.constant 0 : index
    %67 = vector.load %arg12[%c0_33, %c0_34] : memref<2x128xf32, #tpu.memory_space<vmem>>, vector<2x128xf32>
    tpu.vector_store %arg12[%c0_33, %c0_34], %63 {strides = array<i32>} : memref<2x128xf32, #tpu.memory_space<vmem>>, vector<2x128xf32>,
    %c0_35 = arith.constant 0 : index
    %c0_36 = arith.constant 0 : index
    %68 = vector.load %arg8[%c0_35, %c0_36] : memref<128x128xf32, #tpu.memory_space<vmem>>, vector<128x128xf32>
    %cst_37 = arith.constant dense<0.000000e+00> : vector<2x128xf32>
    %69 = tpu.matmul %65, %68, %cst_37 {dimension_numbers = #tpu.dot_dimension_numbers<[1], [0], [0], [1], [0, 0, 1, 1], [], []>} : vector<2x128xf32>, vector<128x128xf32>, vector<2x128xf32> -> vector<2x128xf32>
    %c0_38 = arith.constant 0 : index
    %c0_39 = arith.constant 0 : index
    %70 = vector.load %arg9[%c0_38, %c0_39] : memref<1x128xf32, #tpu.memory_space<vmem>>, vector<1x128xf32>
    %71 = vector.broadcast %70 : vector<1x128xf32> to vector<2x128xf32>
    %72 = arith.addf %69, %71 : vector<2x128xf32>
    %c0_40 = arith.constant 0 : index
    %c0_41 = arith.constant 0 : index
    %c0_42 = arith.constant 0 : index
    %73 = vector.load %arg10[%c0_40, %c0_41, %c0_42] : memref<1x2x128xf32, #tpu.memory_space<vmem>>, vector<1x2x128xf32>
    %74 = vector.shape_cast %73 : vector<1x2x128xf32> to vector<2x128xf32>
    %75 = vector.shape_cast %72 : vector<2x128xf32> to vector<1x2x128xf32>
    tpu.vector_store %arg10[%c0_40, %c0_41, %c0_42], %75 {strides = array<i32>} : memref<1x2x128xf32, #tpu.memory_space<vmem>>, vector<1x2x128xf32>,
    return
  }
  func.func @transform_0(%arg0: i32) -> (i32, i32, i32) {
    %c0_i32 = arith.constant 0 : i32
    %c0_i32_0 = arith.constant 0 : i32
    %c0_i32_1 = arith.constant 0 : i32
    return %arg0, %c0_i32, %c0_i32_0 : i32, i32, i32
  }
  func.func @transform_1(%arg0: i32) -> (i32, i32, i32) {
    %c0_i32 = arith.constant 0 : i32
    %c0_i32_0 = arith.constant 0 : i32
    %c0_i32_1 = arith.constant 0 : i32
    %c0_i32_2 = arith.constant 0 : i32
    return %c0_i32, %c0_i32_0, %c0_i32_1 : i32, i32, i32
  }
  func.func @transform_2(%arg0: i32) -> (i32, i32, i32) {
    %c0_i32 = arith.constant 0 : i32
    %c0_i32_0 = arith.constant 0 : i32
    %c0_i32_1 = arith.constant 0 : i32
    %c0_i32_2 = arith.constant 0 : i32
    return %c0_i32, %c0_i32_0, %c0_i32_1 : i32, i32, i32
  }
  func.func @transform_3(%arg0: i32) -> (i32, i32) {
    %c0_i32 = arith.constant 0 : i32
    %c0_i32_0 = arith.constant 0 : i32
    %c0_i32_1 = arith.constant 0 : i32
    return %c0_i32, %c0_i32_0 : i32, i32
  }
  func.func @transform_4(%arg0: i32) -> (i32, i32) {
    %c0_i32 = arith.constant 0 : i32
    %c0_i32_0 = arith.constant 0 : i32
    %c0_i32_1 = arith.constant 0 : i32
    return %c0_i32, %c0_i32_0 : i32, i32
  }
  func.func @transform_5(%arg0: i32) -> (i32, i32) {
    %c0_i32 = arith.constant 0 : i32
    %c0_i32_0 = arith.constant 0 : i32
    %c0_i32_1 = arith.constant 0 : i32
    return %c0_i32, %c0_i32_0 : i32, i32
  }
  func.func @transform_6(%arg0: i32) -> (i32, i32) {
    %c0_i32 = arith.constant 0 : i32
    %c0_i32_0 = arith.constant 0 : i32
    %c0_i32_1 = arith.constant 0 : i32
    return %c0_i32, %c0_i32_0 : i32, i32
  }
  func.func @transform_7(%arg0: i32) -> (i32, i32) {
    %c0_i32 = arith.constant 0 : i32
    %c0_i32_0 = arith.constant 0 : i32
    %c0_i32_1 = arith.constant 0 : i32
    return %c0_i32, %c0_i32_0 : i32, i32
  }
  func.func @transform_8(%arg0: i32) -> (i32, i32) {
    %c0_i32 = arith.constant 0 : i32
    %c0_i32_0 = arith.constant 0 : i32
    %c0_i32_1 = arith.constant 0 : i32
    return %c0_i32, %c0_i32_0 : i32, i32
  }
  func.func @transform_9(%arg0: i32) -> (i32, i32, i32) {
    %c0_i32 = arith.constant 0 : i32
    %c0_i32_0 = arith.constant 0 : i32
    %c0_i32_1 = arith.constant 0 : i32
    return %arg0, %c0_i32, %c0_i32_0 : i32, i32, i32
  }
}

</mosaic_0001>

<bundles_post_ra>
// kernel: tpu_custom_call.1
= control target key start
LH: loop header
LB: loop body
LE: loop exit
PB: predicated region body
PF: predicated region fallthrough
CT: control target
= control target key end

     0   :  { %s2279_s0 = inlined_call_operand.hbm [shape: f32[8,2,512], index: 0, kind: input, shape index: {}]   ;;  %s2280_s1 = inlined_call_operand.hbm [shape: f32[2,8,32], index: 1, kind: input, shape index: {}]   ;;  %s2281_s2 = inlined_call_operand.hbm [shape: f32[2,8,128], index: 2, kind: input, shape index: {}]   ;;  %s2282_s3 = inlined_call_operand.hbm [shape: f32[128,128], index: 3, kind: input, shape index: {}]   ;;  %s2283_s4 = inlined_call_operand.vmem [shape: f32[1,128], index: 4, kind: input, shape index: {}]   ;;  %s2284_s5 = inlined_call_operand.hbm [shape: f32[32,512], index: 5, kind: input, shape index: {}]   ;;  %s2285_s6 = inlined_call_operand.hbm [shape: f32[128,512], index: 6, kind: input, shape index: {}]   ;;  %s2286_s7 = inlined_call_operand.hbm [shape: f32[128,128], index: 7, kind: input, shape index: {}]   ;;  %s2287_s8 = inlined_call_operand.vmem [shape: f32[1,128], index: 8, kind: input, shape index: {}]   ;;  %s2288_s9 = inlined_call_operand.hbm [shape: f32[8,2,128], index: 9, kind: output, shape index: {}]  }
   0x1   :  { %2293 = sst [smem:[#allocation22_spill]] %s2280_s1 }
   0x2   :  { %2294 = sst [smem:[#allocation23_spill]] %s2281_s2 }
   0x3   :  { %2295 = sst [smem:[#allocation24_spill]] %s2282_s3 }
   0x4   :  { %2296 = sst [smem:[#allocation25_spill]] %s2284_s5 }
   0x5   :  { %14 = vsyncpa [#allocation5], 0 }
   0x6   :  { %16 = vsyncpa [#allocation5 + $0x1], 0 }
   0x7   :  { %17 = vsyncpa [#allocation8], 0 }
   0x8   :  { %18 = vsyncpa [#allocation11], 0 }
   0x9   :  { %19 = vsyncpa [#allocation14], 0 }
   0xa   :  { %20 = vsyncpa [#allocation6], 0 }
   0xb   :  { %22 = vsyncpa [#allocation6 + $0x1], 0  ;;  %s1954_s30 = smov 0   ;;  %s1956_s10 = smov 0  }
   0xc   :  { %s1958_s11 = smov 0   ;;  %s1960_s12 = smov 0  }
   0xd LB: > { %s1886_s13 = smov [#allocation7]   ;;  %s1975_s15 = sadd.s32 4294967295, %s1884_s12   ;;  %s1884_s12 = sphi %s1960_s12, %s2323_s12   ;;  %s1880_s11 = sphi %s1958_s11, %s2322_s11   ;;  %s1876_s10 = sphi %s1956_s10, %s2321_s10   ;;  %s1872_s30 = sphi %s1954_s30, %s2320_s30  }
   0xe   : > { %s265_s14 = sshll.u32 %s1886_s13, 4  ;;  %p1341_p0 = scmp.ge.s32.totalorder %s1884_s12, 1  ;;  %s266_s14 = int_to_ptr.vmem [resolvable:$true] %s265_s14 }
   0xf   : > { %p2289_p1 = scmp.eq.s32.totalorder %s1975_s15, 0  ;;  %p253_p2 = scmp.lt.s32.totalorder %s1884_s12, 9 }
  0x10   : > { %s1887_s17 = smov [#allocation10]   ;;  %s1888_s20 = smov [#allocation13]  }
  0x11   : > { %p1981_p4 = pnand %p1341_p0, %p253_p2  ;;  %s291_s18 = sshll.u32 %s1887_s17, 4  ;;  %s292_s18 = int_to_ptr.vmem [resolvable:$true] %s291_s18 }
  0x12   : > { %s320_s21 = sshll.u32 %s1888_s20, 4  ;;  %s1635_s23 = scalar_lea.vmem %s266_s14, 256  ;;  %s321_s21 = int_to_ptr.vmem [resolvable:$true] %s320_s21 }
  0x13   : > { %s2297_s16 = scalar_select %p1981_p4, 1, 0 }
  0x14   : > { %p1506_p5 = pneg %p1981_p4  ;;  %p1636_p8 = scmp.ne.s32.totalorder %s266_s14, %s1635_s23 }
  0x15   : > { %p1643_p11 = scmp.lt.s32.totalorder %s266_s14, %s266_s14  ;;  %p1644_p12 = scmp.lt.s32.totalorder %s1635_s23, %s1635_s23 }
  0x16   : > { %p1989_p6 = pnand %p1506_p5, %p2289_p1 }
  0x17   : > { %p1645_p13 = por %p1644_p12, %p1643_p11 }
  0x18   : > { %p1995_p7 = pneg %p1989_p6 }
  0x1a   : > { %p1638_p9 = pnand %p1636_p8, %p1995_p7 }
  0x1c   : > { %p1639_p10 = pneg %p1638_p9 }
  0x1e   : > { %p1646_p0 = pnand %p1645_p13, %p1639_p10 }
  0x20   : > { %1649 = shalt.err (!%p1646_p0)
}
  0x21   : > { %s1889_s24 = smov 128   ;;  %s1890_s25 = smov 8  }
  0x22   : > { %s2300_s1 = sld [smem:[#allocation22_spill]]  ;;  %s1661_s28 = scalar_lea.vmem %s292_s18, 2048 }
  0x23   : > { %p1662_p2 = scmp.ne.s32.totalorder %s292_s18, %s1661_s28  ;;  %p1669_p9 = scmp.lt.s32.totalorder %s292_s18, %s292_s18 }
  0x24   : > { %p1670_p10 = scmp.lt.s32.totalorder %s1661_s28, %s1661_s28 }
  0x25   : > { %p1664_p5 = pnand %p1662_p2, %p1995_p7 }
  0x26   : > { %p1671_p11 = por %p1670_p10, %p1669_p9 }
  0x27   : > { %p1665_p8 = pneg %p1664_p5 }
  0x28   : > { %1509 = dma.hbm_to_vmem [thread:$0]  (!%p1989_p6), %s2300_s1, 256, %s266_s14, [#allocation8], %s1889_s24, %s1889_s24, %s1890_s25  }
  0x29   : > { %p1672_p12 = pnand %p1671_p11, %p1665_p8 }
  0x2b   : > { %1675 = shalt.err (!%p1672_p12)
}
  0x2c   : > { %s2301_s3 = sld [smem:[#allocation24_spill]]  ;;  %s1687_s14 = scalar_lea.vmem %s321_s21, 8192 }
  0x2d   : > { %p1688_p13 = scmp.ne.s32.totalorder %s321_s21, %s1687_s14  ;;  %p1695_p5 = scmp.lt.s32.totalorder %s321_s21, %s321_s21 }
  0x2e   : > { %p1696_p9 = scmp.lt.s32.totalorder %s1687_s14, %s1687_s14 }
  0x2f   : > { %p1690_p0 = pnand %p1688_p13, %p1995_p7 }
  0x30   : > { %p1697_p8 = por %p1696_p9, %p1695_p5 }
  0x31   : > { %p1691_p2 = pneg %p1690_p0 }
  0x32   : > { %1515 = dma.hbm_to_vmem [thread:$0]  (!%p1989_p6), %s2301_s3, 2048, %s292_s18, [#allocation11], %s1889_s24, %s1889_s24, %s1890_s25  }
  0x33   : > { %p1698_p10 = pnand %p1697_p8, %p1691_p2 }
  0x35   : > { %1701 = shalt.err (!%p1698_p10)
}
  0x36   : > { %s1891_s17 = smov 512   ;;  %s1892_s20 = smov 32  }
  0x37   : > { %1521 = dma.hbm_to_vmem [thread:$0]  (!%p1989_p6), %s2285_s6, 8192, %s321_s21, [#allocation14], %s1891_s17, %s1891_s17, %s1892_s20  }
  0x38   : > { %s1893_s26 = smov [#allocation9]   ;;  %s1894_s28 = smov [#allocation12]  }
  0x39   : > { %s278_s27 = sshll.u32 %s1893_s26, 4  ;;  %s307_s29 = sshll.u32 %s1894_s28, 4  ;;  %s279_s27 = int_to_ptr.vmem [resolvable:$true] %s278_s27  ;;  %s308_s29 = int_to_ptr.vmem [resolvable:$true] %s307_s29 }
  0x3a   : > { %s1713_s13 = scalar_lea.vmem %s279_s27, 256  ;;  %p1721_p0 = scmp.lt.s32.totalorder %s279_s27, %s279_s27 }
  0x3b   : > { %p1714_p11 = scmp.ne.s32.totalorder %s279_s27, %s1713_s13  ;;  %p1722_p2 = scmp.lt.s32.totalorder %s1713_s13, %s1713_s13 }
  0x3d   : > { %p1716_p12 = pnand %p1714_p11, %p1995_p7  ;;  %p1723_p5 = por %p1722_p2, %p1721_p0 }
  0x3f   : > { %p1717_p13 = pneg %p1716_p12 }
  0x41   : > { %p1724_p9 = pnand %p1723_p5, %p1717_p13 }
  0x43   : > { %1727 = shalt.err (!%p1724_p9)
}
  0x44   : > { %s2302_s2 = sld [smem:[#allocation23_spill]]  ;;  %s1739_s18 = scalar_lea.vmem %s308_s29, 2048 }
  0x45   : > { %p1740_p8 = scmp.ne.s32.totalorder %s308_s29, %s1739_s18  ;;  %p1747_p12 = scmp.lt.s32.totalorder %s308_s29, %s308_s29 }
  0x46   : > { %p1748_p0 = scmp.lt.s32.totalorder %s1739_s18, %s1739_s18 }
  0x47   : > { %p1742_p10 = pnand %p1740_p8, %p1995_p7 }
  0x48   : > { %p1749_p13 = por %p1748_p0, %p1747_p12 }
  0x49   : > { %p1743_p11 = pneg %p1742_p10 }
  0x4a   : > { %1512 = dma.hbm_to_vmem [thread:$0]  (!%p1989_p6), %s2302_s2, 256, %s279_s27, [#allocation8], %s1889_s24, %s1889_s24, %s1890_s25  }
  0x4b   : > { %p1750_p2 = pnand %p1749_p13, %p1743_p11 }
  0x4d   : > { %1753 = shalt.err (!%p1750_p2)
}
  0x4e   : > { %s2303_s5 = sld [smem:[#allocation25_spill]]  ;;  %s1895_s27 = smov [#allocation15]  }
  0x4f   : > { %s333_s28 = sshll.u32 %s1895_s27, 4  ;;  %s334_s28 = int_to_ptr.vmem [resolvable:$true] %s333_s28 }
  0x50   : > { %s1765_s13 = scalar_lea.vmem %s334_s28, 2048  ;;  %p1773_p10 = scmp.lt.s32.totalorder %s334_s28, %s334_s28 }
  0x51   : > { %p1766_p5 = scmp.ne.s32.totalorder %s334_s28, %s1765_s13  ;;  %p1774_p11 = scmp.lt.s32.totalorder %s1765_s13, %s1765_s13 }
  0x53   : > { %p1768_p9 = pnand %p1766_p5, %p1995_p7  ;;  %p1775_p12 = por %p1774_p11, %p1773_p10 }
  0x54   : > { %1518 = dma.hbm_to_vmem [thread:$0]  (!%p1989_p6), %s2303_s5, 2048, %s308_s29, [#allocation11], %s1891_s17, %s1891_s17, %s1892_s20  }
  0x55   : > { %p1769_p8 = pneg %p1768_p9 }
  0x57   : > { %p1776_p0 = pnand %p1775_p12, %p1769_p8 }
  0x59   : > { %1779 = shalt.err (!%p1776_p0)
}
  0x5a   : > { %1524 = dma.hbm_to_vmem [thread:$0]  (!%p1989_p6), %s2286_s7, 2048, %s334_s28, [#allocation14], %s1889_s24, %s1889_s24, %s1890_s25  }
  0x5b   : > { %s1340_s19 = sadd.s32 4294967294, %s1884_s12   ;;  %s2061_s22 = sadd.s32 1, %s1884_s12  }
  0x5c   : > { %s32_s20 = ssub.s32 %s1884_s12, %s2061_s22  ;;  %s35_s29 = sadd.s32 1, %s1880_s11 }
  0x5d   : > { %p33_p7 = scmp.eq.s32.totalorder %s32_s20, 0  ;;  %p42_p13 = scmp.ne.s32.totalorder %s1880_s11, %s1876_s10 }
  0x5e   : > { %p43_p2 = scmp.eq.s32.totalorder %s1884_s12, 0  ;;  %p48_p5 = scmp.ne.s32.totalorder %s1876_s10, %s1872_s30 }
  0x5f   : > { %s2072_s14 = scalar_select %p33_p7, %s1880_s11, %s35_s29  }
  0x60   : > { %p2074_p9 = por %p43_p2, %p42_p13  ;;  %p2080_p6 = por %p2289_p1, %p48_p5 }
  0x61   : > { %p240_p8 = scmp.eq.s32.totalorder %s1975_s15, 7  ;;  %p246_p10 = scmp.eq.s32.totalorder %s1340_s19, 7 }
  0x62   : > { %s2305_s24 = scalar_select %p2080_p6, 1, 0 }
  0x63   : > { %p1539_p11 = scmp.lt.s32.totalorder %s1884_s12, 8  ;;  %s350_s25 = sand.u32 1, %s1880_s11  }
  0x64   : > { %p2087_p12 = por %p240_p8, %p42_p13  ;;  %p2091_p0 = por %p246_p10, %p48_p5 }
  0x65   : > { %s1349_s27 = sshll.u32 %s350_s25, 3  ;;  %s1373_s28 = sshll.u32 %s1884_s12, 7 }
  0x66   : > { %s2306_s23 = scalar_select %p2087_p12, 1, 0 }
  0x67   : > { %s2307_s26 = scalar_select %p2091_p0, 1, 0 }
  0x68   : > { %s2099_s17 = scalar_lea.hbm %s2279_s0, %s1373_s28  ;;  %s354_s19 = scalar_lea.vmem [#allocation4], %s1349_s27 }
  0x69   : > { %s362_s20 = sshll.u32 %s354_s19, 4  ;;  %p2103_p7 = pnand %p1539_p11, %p2074_p9  ;;  %s363_s20 = int_to_ptr.vmem [resolvable:$true] %s362_s20 }
  0x6a   : > { %s351_s1 = scalar_lea.sflag [#allocation5], %s350_s25  ;;  %s1780_s2 = scalar_lea.hbm %s2099_s17, 128 }
  0x6b   : > { %p1781_p13 = scmp.ne.s32.totalorder %s2099_s17, %s1780_s2  ;;  %p1782_p2 = pneg %p2103_p7 }
  0x6c   : > { %s1785_s21 = scalar_lea.hbm %s2279_s0, 1024  ;;  %p1786_p10 = scmp.lt.s32.totalorder %s2099_s17, %s2279_s0 }
  0x6d   : > { %p1783_p5 = pnand %p1782_p2, %p1781_p13  ;;  %p1787_p9 = scmp.lt.s32.totalorder %s1785_s21, %s1780_s2 }
  0x6f   : > { %p1784_p8 = pneg %p1783_p5  ;;  %p1788_p11 = por %p1787_p9, %p1786_p10 }
  0x71   : > { %p1789_p3 = pnand %p1788_p11, %p1784_p8 }
  0x73   : > { %1792 = shalt.err (!%p1789_p3)
}
  0x74   : > { %s1793_s18 = scalar_lea.vmem %s363_s20, 128  ;;  %s1896_s25 = smov [#allocation4]  }
  0x75   : > { %p1794_p1 = scmp.ne.s32.totalorder %s363_s20, %s1793_s18  ;;  %s1798_s3 = sshll.u32 %s1896_s25, 4  ;;  %s1799_s3 = int_to_ptr.vmem [resolvable:$false] %s1798_s3 }
  0x76   : > { %s1800_s5 = scalar_lea.vmem %s1799_s3, 256  ;;  %p1801_p13 = scmp.lt.s32.totalorder %s363_s20, %s1799_s3 }
  0x77   : > { %p1796_p0 = pnand %p1794_p1, %p1782_p2  ;;  %p1802_p5 = scmp.lt.s32.totalorder %s1800_s5, %s1793_s18 }
  0x79   : > { %p1797_p12 = pneg %p1796_p0  ;;  %p1803_p6 = por %p1802_p5, %p1801_p13 }
  0x7b   : > { %p1804_p4 = pnand %p1803_p6, %p1797_p12 }
  0x7d   : > { %1807 = shalt.err (!%p1804_p4)
}
  0x7e   : > { %1528 = dma.hbm_to_vmem [thread:$0]  (!%p2103_p7), %s2099_s17, 128, %s363_s20, %s351_s1  }
  0x7f   : > { %p2309_p8 = scmp.ne.s32.totalorder %s2297_s16, 0 }
  0x80   : > { %s2124_s2 = sand.u32 (!%p2309_p8), 1, %s1876_s10   ;;  %p2310_p1 = scmp.ne.s32.totalorder (!%p2309_p8), %s2305_s24, 0 }
  0x81   : > { %371 = sbr.rel (%p2309_p8) target bundleno = 1595 (0x63b), region = 56  ;;  %s1353_s28 = sshll.u32 (!%p2309_p8), %s2124_s2, 3 }
  0x82   : > { %s374_s13 = scalar_lea.sflag (!%p2309_p8), [#allocation5], %s2124_s2  ;;  %s2128_s3 = scalar_lea.vmem (!%p2309_p8), [#allocation4], %s1353_s28 }
  0x86   : > { %1851 = dma.done.wait (%p2310_p1), %s374_s13, 128  }
  0x87   : > { %1853 = vsyncadd (%p2310_p1), %s374_s13, 4294967168  ;;  %p2311_p3 = scmp.eq.s32.totalorder %s1975_s15, 0 }
  0x89   : > { %1855 = dma.done.wait (%p2311_p3), [#allocation8], 512   ;;  %p2312_p4 = pmov %p2311_p3 }
  0x8a   : > { %p2313_p6 = pmov %p2311_p3 }
  0x8b   : > { %1857 = vsyncadd (%p2312_p4), [#allocation8], 4294966784 }
  0x8c   : > { %1859 = dma.done.wait (%p2313_p6), [#allocation11], 4096   ;;  %p2314_p12 = pmov %p2311_p3 }
  0x8d   : > { %p2315_p0 = pmov %p2311_p3 }
  0x8e   : > { %1861 = vsyncadd (%p2314_p12), [#allocation11], 4294963200 }
  0x8f   : > { %1863 = dma.done.wait (%p2315_p0), [#allocation14], 10240   ;;  %p2316_p7 = pmov %p2315_p0 }
  0x90   : > { %s1360_s1 = sshll.u32 %s2124_s2, 1  ;;  %p2317_p2 = scmp.ne.s32.totalorder %s1975_s15, 0 }
  0x91   : > { %1865 = vsyncadd (%p2316_p7), [#allocation14], 4294957056  ;;  %s2147_s5 = scalar_lea.vmem [#allocation16], %s1360_s1 }
  0x92   : > { %439 = sbr.rel (%p2317_p2) target bundleno = 153 (0x99), region = 88 }
  0x97   : > { %v1897_v0 = vmov 0.0  }
  0x98   : > { %440 = vst [vmem:[#allocation2] sm:$0x3] %v1897_v0  ;;  %441 = vst [vmem:[#allocation3] sm:$0x3] %v1897_v0 }
  0x99 PF: > { %v459_v1 = vld [vmem:[#allocation10 + $0x78] sm:$0xff]  ;;  %v1898_v2 = vmov 0.0   ;;  %v458_v3 = vld [vmem:[#allocation10 + $0x70] sm:$0xff]  ;;  %vm1899_vm0 = vmmov 0   ;;  %v457_v4 = vld [vmem:[#allocation10 + $0x68] sm:$0xff]  ;;  %v536_v21 = vlaneseq  ;;  %vm594_vm1 = vcmask 1041409  }
  0x9a   : > { %1408 = vmatprep.subr.mxu0 %v1898_v2  ;;  %1440 = vmatprep.mubr.msk.f32.mxu0 %vm1899_vm0, %v1898_v2  ;;  %v456_v5 = vld [vmem:[#allocation10 + $0x60] sm:$0xff]  ;;  %v455_v6 = vld [vmem:[#allocation10 + $0x58] sm:$0xff]  ;;  %v454_v7 = vld [vmem:[#allocation10 + $0x50] sm:$0xff]  ;;  %v1900_v19 = vmov 1966171168   ;;  %vm597_vm2 = vcmask 58368  }
  0x9b   : > { %1409 = vmatpush3.msra.mxu0 %v459_v1  ;;  %827 = vmatprep.mubr.f32.mxu1 %v1898_v2  ;;  %v453_v8 = vld [vmem:[#allocation10 + $0x48] sm:$0xff]  ;;  %v452_v9 = vld [vmem:[#allocation10 + $0x40] sm:$0xff]  ;;  %v451_v10 = vld [vmem:[#allocation10 + $0x38] sm:$0xff]  ;;  %v534_v20 = vunpack.c.l.s4 %v1900_v19  ;;  %v2174_v23 = vshrl.u32 %v536_v21, 7  ;;  %v585_v43 = vand.u32 127, %v536_v21  ;;  %v1901_v51 = vmov 0  }
  0x9c   : > { %1410 = vmatprep.subr.mxu0 %v1898_v2  ;;  %v450_v11 = vld [vmem:[#allocation10 + $0x30] sm:$0xff]  ;;  %v449_v12 = vld [vmem:[#allocation10 + $0x28] sm:$0xff]  ;;  %v448_v13 = vld [vmem:[#allocation10 + $0x20] sm:$0xff]  ;;  %1596 = vset.pattern.permute.xlu0 %v1901_v51  ;;  %vm668_vm3 = vcmask 261120   ;;  %s1370_s29 = sshll.u32 %s1975_s15, 5  ;;  %s1213_s21 = sshll.u32 %s2147_s5, 4  ;;  %s1214_s21 = int_to_ptr.vmem [resolvable:$true] %s1213_s21 }
  0x9d   : > { %1411 = vmatpush3.msra.mxu0 %v458_v3  ;;  %v447_v14 = vld [vmem:[#allocation10 + $0x18] sm:$0xff]  ;;  %v446_v15 = vld [vmem:[#allocation10 + $0x10] sm:$0xff]  ;;  %v445_v16 = vld [vmem:[#allocation10 + $0x8] sm:$0xff]  ;;  %v535_v22 = vunpack.c.0.s8 %v534_v20  ;;  %v2178_v27 = vsub.s32 0, %v2174_v23  ;;  %v588_v45 = vsub.s32 %v585_v43, %v2174_v23  ;;  %1595 = vset.pattern.permute.xlu1 %v1901_v51  ;;  %v608_v52 = vsub.s32 1, %v2174_v23  ;;  %s2242_s18 = scalar_lea.hbm %s2288_s9, %s1370_s29  ;;  %s1200_s25 = scalar_lea.sflag [#allocation6], %s2124_s2 }
  0x9e   : > { %1412 = vmatprep.subr.mxu0 %v1898_v2  ;;  %v444_v17 = vld [vmem:[#allocation10] sm:$0xff]  ;;  %v530_v31 = vld [vmem:[#allocation9] sm:$0xff]  ;;  %v531_v34 = vld [vmem:[#allocation9 + $0x8] sm:$0xff]  ;;  %s1808_s28 = scalar_lea.vmem %s1214_s21, 32  ;;  %p2318_p9 = scmp.ne.s32.totalorder %s2306_s23, 0 }
  0x9f   : > { %1413 = vmatpush3.msra.mxu0 %v457_v4  ;;  %v2169_v18 = vld [vmem:[#allocation2] sm:$0x3]  ;;  %v538_v24 = vsub.s32 %v535_v22, %v2174_v23  ;;  %v749_v20 = vld [vmem:[#allocation13 + $0x190] sm:$0xff]  ;;  %v747_v21 = vld [vmem:[#allocation13 + $0x180] sm:$0xff]  ;;  %p1809_p10 = scmp.ne.s32.totalorder %s1214_s21, %s1808_s28  ;;  %s1903_s13 = smov [#allocation16]  }
  0xa0   : > { %1414 = vmatprep.subr.mxu0 %v1898_v2  ;;  %v1362_v38 = vld [vmem:[%s2283_s4] ss:$0 sm:$0xff]  ;;  %v746_v22 = vld [vmem:[#allocation13 + $0x178] sm:$0xff]  ;;  %v727_v43 = vld [vmem:[#allocation13 + $0xe0] sm:$0xff] }
  0xa1   : > { %1415 = vmatpush3.msra.mxu0 %v456_v5  ;;  %v762_v5 = vld [vmem:[#allocation13 + $0x1f8] sm:$0xff]  ;;  %v748_v19 = vld [vmem:[#allocation13 + $0x188] sm:$0xff]  ;;  %p1810_p11 = pnand %p1809_p10, %p2318_p9 }
  0xa2   : > { %1416 = vmatprep.subr.mxu0 %v1898_v2  ;;  %v720_v51 = vld [vmem:[#allocation13 + $0xa8] sm:$0xff] }
  0xa3   : > { %1417 = vmatpush3.msra.mxu0 %v455_v6  ;;  %v760_v6 = vld [vmem:[#allocation13 + $0x1e8] sm:$0xff]  ;;  %p1811_p13 = pneg %p1810_p11 }
  0xa4   : > { %1418 = vmatprep.subr.mxu0 %v1898_v2  ;;  %763 = vmatprep.subr.mxu1 %v760_v6  ;;  %v709_v6 = vld [vmem:[#allocation13 + $0x50] sm:$0xff] }
  0xa5   : > { %1419 = vmatpush3.msra.mxu0 %v454_v7  ;;  %v761_v7 = vld [vmem:[#allocation13 + $0x1f0] sm:$0xff] }
  0xa6   : > { %1420 = vmatprep.subr.mxu0 %v1898_v2 }
  0xa7   : > { %1421 = vmatpush3.msra.mxu0 %v453_v8  ;;  %v759_v8 = vld [vmem:[#allocation13 + $0x1e0] sm:$0xff] }
  0xa8   : > { %1422 = vmatprep.subr.mxu0 %v1898_v2  ;;  %764 = vmatpush1.msra.mxu1 %v759_v8  ;;  %v704_v8 = vld [vmem:[#allocation13 + $0x28] sm:$0xff] }
  0xa9   : > { %1423 = vmatpush3.msra.mxu0 %v452_v9  ;;  %v758_v9 = vld [vmem:[#allocation13 + $0x1d8] sm:$0xff] }
  0xaa   : > { %1424 = vmatprep.subr.mxu0 %v1898_v2 }
  0xab   : > { %1425 = vmatpush3.msra.mxu0 %v451_v10  ;;  %v756_v10 = vld [vmem:[#allocation13 + $0x1c8] sm:$0xff] }
  0xac   : > { %1426 = vmatprep.subr.mxu0 %v1898_v2  ;;  %765 = vmatprep.subr.mxu1 %v756_v10  ;;  %v703_v10 = vld [vmem:[#allocation13 + $0x20] sm:$0xff] }
  0xad   : > { %1427 = vmatpush3.msra.mxu0 %v450_v11  ;;  %v757_v11 = vld [vmem:[#allocation13 + $0x1d0] sm:$0xff] }
  0xae   : > { %1428 = vmatprep.subr.mxu0 %v1898_v2 }
  0xaf   : > { %1429 = vmatpush3.msra.mxu0 %v449_v12  ;;  %v755_v12 = vld [vmem:[#allocation13 + $0x1c0] sm:$0xff] }
  0xb0   : > { %1430 = vmatprep.subr.mxu0 %v1898_v2  ;;  %766 = vmatpush1.msra.mxu1 %v755_v12  ;;  %v700_v12 = vld [vmem:[#allocation13 + $0x8] sm:$0xff] }
  0xb1   : > { %1431 = vmatpush3.msra.mxu0 %v448_v13  ;;  %v754_v13 = vld [vmem:[#allocation13 + $0x1b8] sm:$0xff] }
  0xb2   : > { %1432 = vmatprep.subr.mxu0 %v1898_v2 }
  0xb3   : > { %1433 = vmatpush3.msra.mxu0 %v447_v14  ;;  %v752_v14 = vld [vmem:[#allocation13 + $0x1a8] sm:$0xff] }
  0xb4   : > { %1434 = vmatprep.subr.mxu0 %v1898_v2  ;;  %767 = vmatprep.subr.mxu1 %v752_v14  ;;  %v699_v14 = vld [vmem:[#allocation13] sm:$0xff] }
  0xb5   : > { %1435 = vmatpush3.msra.mxu0 %v446_v15  ;;  %v753_v15 = vld [vmem:[#allocation13 + $0x1b0] sm:$0xff] }
  0xb6   : > { %1436 = vmatprep.subr.mxu0 %v1898_v2 }
  0xb7   : > { %1437 = vmatpush3.msra.mxu0 %v445_v16  ;;  %v751_v16 = vld [vmem:[#allocation13 + $0x1a0] sm:$0xff] }
  0xb8   : > { %1438 = vmatprep.subr.mxu0 %v1898_v2  ;;  %768 = vmatpush1.msra.mxu1 %v751_v16  ;;  %v695_v16 = vld [vmem:[#allocation12 + $0x60] sm:$0xff] }
  0xb9   : > { %1439 = vmatpush3.msra.mxu0 %v444_v17  ;;  %v750_v17 = vld [vmem:[#allocation13 + $0x198] sm:$0xff]  ;;  %769 = vmatprep.subr.mxu1 %v748_v19  ;;  %v692_v19 = vld [vmem:[#allocation12 + $0x48] sm:$0xff] }
  0xba   : > { %1441 = vmatmul.mubr.f32.vlgmr.msra.gmra.mxu0 %v2169_v18  ;;  %834 = vmatprep.subr.mxu0 %v762_v5  ;;  %v708_v5 = vld [vmem:[#allocation13 + $0x48] sm:$0xff] }
  0xbb   : > { %898 = vmatprep.mubr.f32.mxu0 %v1898_v2  ;;  %835 = vmatpush1.msra.mxu0 %v761_v7  ;;  %v706_v7 = vld [vmem:[#allocation13 + $0x38] sm:$0xff] }
  0xbc   : > { %836 = vmatprep.subr.mxu0 %v758_v9  ;;  %770 = vmatpush1.msra.mxu1 %v747_v21  ;;  %v705_v9 = vld [vmem:[#allocation13 + $0x30] sm:$0xff]  ;;  %v691_v21 = vld [vmem:[#allocation12 + $0x40] sm:$0xff] }
  0xbd   : > { %837 = vmatpush1.msra.mxu0 %v757_v11  ;;  %v702_v11 = vld [vmem:[#allocation13 + $0x18] sm:$0xff] }
  0xbe   : > { %838 = vmatprep.subr.mxu0 %v754_v13  ;;  %v701_v13 = vld [vmem:[#allocation13 + $0x10] sm:$0xff] }
  0xbf   : > { %839 = vmatpush1.msra.mxu0 %v753_v15  ;;  %v698_v15 = vld [vmem:[#allocation12 + $0x78] sm:$0xff] }
  0xc0   : > { %840 = vmatprep.subr.mxu0 %v750_v17  ;;  %v697_v17 = vld [vmem:[#allocation12 + $0x70] sm:$0xff] }
  0xc1   : > { %841 = vmatpush1.msra.mxu0 %v749_v20  ;;  %v694_v20 = vld [vmem:[#allocation12 + $0x58] sm:$0xff] }
  0xc2   : > { %842 = vmatprep.subr.mxu0 %v746_v22  ;;  %v693_v22 = vld [vmem:[#allocation12 + $0x50] sm:$0xff] }
 0x17a   : > { %v526_v25 = vpop.f32.mrf.mxu0 }
 0x17b   : > { %v539_v26 = vrot.slane %v526_v25, %v538_v24  ;;  %v745_v25 = vld [vmem:[#allocation13 + $0x170] sm:$0xff] }
 0x17c   : > { %v1442_v28 = vpop.f32.mrf.mxu0  ;;  %843 = vmatpush1.msra.mxu0 %v745_v25  ;;  %v690_v25 = vld [vmem:[#allocation12 + $0x38] sm:$0xff] }
 0x17d   : > { %v540_v29 = vcombine.high %v539_v26, %v539_v26  ;;  %v547_v30 = vrot.slane %v539_v26, %v538_v24  ;;  %v743_v26 = vld [vmem:[#allocation13 + $0x160] sm:$0xff]  ;;  %v742_v28 = vld [vmem:[#allocation13 + $0x158] sm:$0xff] }
 0x17e   : > { %844 = vmatprep.subr.mxu0 %v742_v28  ;;  %v689_v28 = vld [vmem:[#allocation12 + $0x30] sm:$0xff] }
 0x17f   : > { %v554_v32 = vrot.slane %v540_v29, %v538_v24  ;;  %v558_v33 = vrot.slane %v547_v30, %v2178_v27  ;;  %v744_v24 = vld [vmem:[#allocation13 + $0x168] sm:$0xff]  ;;  %v741_v30 = vld [vmem:[#allocation13 + $0x150] sm:$0xff] }
 0x180   : > { %v740_v29 = vld [vmem:[#allocation13 + $0x148] sm:$0xff]  ;;  %771 = vmatprep.subr.mxu1 %v744_v24  ;;  %845 = vmatpush1.msra.mxu0 %v741_v30  ;;  %v686_v30 = vld [vmem:[#allocation12 + $0x18] sm:$0xff] }
 0x181   : > { %v562_v35 = vrot.slane %v554_v32, %v2178_v27  ;;  %v565_v36 = vadd.f32 %v558_v33, %v530_v31  ;;  %v739_v31 = vld [vmem:[#allocation13 + $0x140] sm:$0xff]  ;;  %772 = vmatpush1.msra.mxu1 %v743_v26  ;;  %v738_v32 = vld [vmem:[#allocation13 + $0x138] sm:$0xff]  ;;  %v736_v33 = vld [vmem:[#allocation13 + $0x128] sm:$0xff] }
 0x182   : > { %773 = vmatprep.subr.mxu1 %v740_v29  ;;  %846 = vmatprep.subr.mxu0 %v738_v32  ;;  %v688_v24 = vld [vmem:[#allocation12 + $0x28] sm:$0xff]  ;;  %v687_v26 = vld [vmem:[#allocation12 + $0x20] sm:$0xff]  ;;  %v685_v32 = vld [vmem:[#allocation12 + $0x10] sm:$0xff] }
 0x183   : > { %v566_v37 = vadd.f32 %v562_v35, %v531_v34  ;;  %1598 = vtanh.f32 %v565_v36  ;;  %v737_v34 = vld [vmem:[#allocation13 + $0x130] sm:$0xff]  ;;  %v735_v35 = vld [vmem:[#allocation13 + $0x120] sm:$0xff]  ;;  %774 = vmatpush1.msra.mxu1 %v739_v31  ;;  %v734_v36 = vld [vmem:[#allocation13 + $0x118] sm:$0xff] }
 0x184   : > { %775 = vmatprep.subr.mxu1 %v736_v33  ;;  %847 = vmatpush1.msra.mxu0 %v737_v34  ;;  %v684_v29 = vld [vmem:[#allocation12 + $0x8] sm:$0xff]  ;;  %v683_v31 = vld [vmem:[#allocation12] sm:$0xff] }
 0x185   : > { %1600 = vtanh.f32 %v566_v37  ;;  %v732_v37 = vld [vmem:[#allocation13 + $0x108] sm:$0xff]  ;;  %776 = vmatpush1.msra.mxu1 %v735_v35  ;;  %848 = vmatprep.subr.mxu0 %v734_v36 }
 0x186   : > { %777 = vmatprep.subr.mxu1 %v732_v37  ;;  %v655_v35 = vld [vmem:[#allocation7 + $0x8] sm:$0xff] }
 0x190   : > { %v1599_v39 = vpop.eup %1598 }
 0x191   : > { %v576_v40 = vmul.f32 %v1599_v39, %v1362_v38  ;;  %v731_v39 = vld [vmem:[#allocation13 + $0x100] sm:$0xff] }
 0x192   : > { %v1601_v41 = vpop.eup %1600  ;;  %778 = vmatpush1.msra.mxu1 %v731_v39 }
 0x193   : > { %578 = vadd.xlane.f32.xlu0 %v576_v40  ;;  %v577_v42 = vmul.f32 %v1601_v41, %v1362_v38  ;;  %v733_v38 = vld [vmem:[#allocation13 + $0x110] sm:$0xff]  ;;  %v730_v40 = vld [vmem:[#allocation13 + $0xf8] sm:$0xff]  ;;  %v728_v41 = vld [vmem:[#allocation13 + $0xe8] sm:$0xff] }
 0x194   : > { %849 = vmatpush1.msra.mxu0 %v733_v38  ;;  %779 = vmatprep.subr.mxu1 %v728_v41 }
 0x195   : > { %850 = vmatprep.subr.mxu0 %v730_v40  ;;  %780 = vmatpush1.msra.mxu1 %v727_v43 }
 0x197   : > { %580 = vadd.xlane.f32.xlu0 %v577_v42  ;;  %v729_v42 = vld [vmem:[#allocation13 + $0xf0] sm:$0xff] }
 0x198   : > { %851 = vmatpush1.msra.mxu0 %v729_v42 }
 0x21c   : > { %v579_v44 = vpop.xlane.xlu0 %578 }
 0x21d   : > { %v589_v47 = vrot.slane %v579_v44, %v588_v45 }
 0x220   : > { %v581_v46 = vpop.xlane.xlu0 %580 }
 0x221   : > { %v593_v48 = vrot.slane %v581_v46, %v588_v45 }
 0x223   : > { %v595_v49 = vsel %vm594_vm1, %v593_v48, %v589_v47  ;;  %v723_v47 = vld [vmem:[#allocation13 + $0xc0] sm:$0xff]  ;;  %v722_v48 = vld [vmem:[#allocation13 + $0xb8] sm:$0xff] }
 0x224   : > { %v598_v50 = vsel %vm597_vm2, %v595_v49, -inf }
 0x225   : > { %599 = vmax.xlane.f32.xlu1 %v598_v50 }
 0x2ae   : > { %v600_v53 = vpop.xlane.xlu1 %599 }
 0x2af   : > { %v605_v54 = vrot.slane %v600_v53, %v2178_v27  ;;  %v609_v55 = vrot.slane %v600_v53, %v608_v52  ;;  %v721_v53 = vld [vmem:[#allocation13 + $0xb0] sm:$0xff] }
 0x2b1   : > { %v612_v56 = vsub.f32 %v579_v44, %v605_v54  ;;  %v613_v57 = vsub.f32 %v581_v46, %v609_v55  ;;  %v726_v44 = vld [vmem:[#allocation13 + $0xd8] sm:$0xff]  ;;  %v725_v46 = vld [vmem:[#allocation13 + $0xd0] sm:$0xff]  ;;  %v719_v55 = vld [vmem:[#allocation13 + $0xa0] sm:$0xff] }
 0x2b2   : > { %852 = vmatprep.subr.mxu0 %v726_v44 }
 0x2b3   : > { %v614_v58 = vmul.f32 1.442695, %v612_v56  ;;  %v616_v59 = vmul.f32 1.442695, %v613_v57  ;;  %853 = vmatpush1.msra.mxu0 %v725_v46  ;;  %v718_v56 = vld [vmem:[#allocation13 + $0x98] sm:$0xff]  ;;  %v716_v57 = vld [vmem:[#allocation13 + $0x88] sm:$0xff] }
 0x2b4   : > { %854 = vmatprep.subr.mxu0 %v722_v48 }
 0x2b5   : > { %1602 = vpow2.f32 %v614_v58  ;;  %855 = vmatpush1.msra.mxu0 %v721_v53  ;;  %v717_v58 = vld [vmem:[#allocation13 + $0x90] sm:$0xff] }
 0x2b6   : > { %1604 = vpow2.f32 %v616_v59  ;;  %856 = vmatprep.subr.mxu0 %v718_v56  ;;  %v1118_v56 = vld [vmem:[#allocation15 + $0x68] sm:$0xff] }
 0x2b7   : > { %857 = vmatpush1.msra.mxu0 %v717_v58  ;;  %v1116_v58 = vld [vmem:[#allocation15 + $0x58] sm:$0xff] }
 0x2c2   : > { %v2192_v60 = vpop.eup %1602 }
 0x2c3   : > { %v2194_v61 = vpop.eup %1604  ;;  %621 = vperm.xlu1 %1595, %v2192_v60  }
 0x2c4   : > { %624 = vperm.xlu0 %1596, %v2194_v61  }
 0x33e   : > { %v622_v62 = vpop.permute.xlu1 %621 }
 0x33f   : > { %v625_v63 = vpop.permute.xlu0 %624  ;;  %v629_v0 = vrot.slane %v622_v62, %v588_v45 }
 0x340   : > { %v633_v1 = vrot.slane %v625_v63, %v588_v45  ;;  %v724_v45 = vld [vmem:[#allocation13 + $0xc8] sm:$0xff]  ;;  %v715_v63 = vld [vmem:[#allocation13 + $0x80] sm:$0xff] }
 0x341   : > { %781 = vmatprep.subr.mxu1 %v724_v45 }
 0x342   : > { %v634_v3 = vsel %vm594_vm1, %v633_v1, %v629_v0  ;;  %782 = vmatpush1.msra.mxu1 %v723_v47  ;;  %v714_v0 = vld [vmem:[#allocation13 + $0x78] sm:$0xff]  ;;  %v713_v1 = vld [vmem:[#allocation13 + $0x70] sm:$0xff] }
 0x343   : > { %v636_v4 = vsel %vm597_vm2, %v634_v3, 0.0  ;;  %783 = vmatprep.subr.mxu1 %v720_v51  ;;  %858 = vmatprep.subr.mxu0 %v714_v0  ;;  %v711_v3 = vld [vmem:[#allocation13 + $0x60] sm:$0xff]  ;;  %v1112_v0 = vld [vmem:[#allocation15 + $0x38] sm:$0xff] }
 0x344   : > { %637 = vadd.xlane.f32.xlu1 %v636_v4  ;;  %784 = vmatpush1.msra.mxu1 %v719_v55  ;;  %v710_v4 = vld [vmem:[#allocation13 + $0x58] sm:$0xff]  ;;  %v1119_v55 = vld [vmem:[#allocation15 + $0x70] sm:$0xff] }
 0x345   : > { %785 = vmatprep.subr.mxu1 %v716_v57  ;;  %859 = vmatpush1.msra.mxu0 %v713_v1  ;;  %v1117_v57 = vld [vmem:[#allocation15 + $0x60] sm:$0xff]  ;;  %v1110_v1 = vld [vmem:[#allocation15 + $0x28] sm:$0xff] }
 0x346   : > { %786 = vmatpush1.msra.mxu1 %v715_v63  ;;  %860 = vmatprep.subr.mxu0 %v710_v4  ;;  %v1113_v63 = vld [vmem:[#allocation15 + $0x40] sm:$0xff]  ;;  %v1108_v4 = vld [vmem:[#allocation15 + $0x18] sm:$0xff] }
 0x347   : > { %861 = vmatpush1.msra.mxu0 %v709_v6  ;;  %v1106_v6 = vld [vmem:[#allocation15 + $0x8] sm:$0xff] }
 0x348   : > { %862 = vmatprep.subr.mxu0 %v706_v7 }
 0x349   : > { %863 = vmatpush1.msra.mxu0 %v705_v9 }
 0x34a   : > { %864 = vmatprep.subr.mxu0 %v702_v11 }
 0x34b   : > { %865 = vmatpush1.msra.mxu0 %v701_v13 }
 0x34c   : > { %899 = vmatmul.mubr.f32.vlgmr.msra.gmra.mxu0 %v2169_v18 }
 0x34d   : > { %974 = vmatprep.mubr.f32.mxu0 %v1898_v2 }
 0x3cd   : > { %v638_v49 = vpop.xlane.xlu1 %637 }
 0x3ce   : > { %1606 = vrcp.f32 %v638_v49 }
 0x3db   : > { %v1607_v50 = vpop.eup %1606 }
 0x3dc   : > { %v645_v54 = vrot.slane %v1607_v50, %v2178_v27  ;;  %v649_v62 = vrot.slane %v1607_v50, %v608_v52  ;;  %v712_v27 = vld [vmem:[#allocation13 + $0x68] sm:$0xff]  ;;  %v707_v52 = vld [vmem:[#allocation13 + $0x40] sm:$0xff] }
 0x3dd   : > { %787 = vmatprep.subr.mxu1 %v712_v27  ;;  %v1111_v27 = vld [vmem:[#allocation15 + $0x30] sm:$0xff] }
 0x3de   : > { %v652_v59 = vmul.f32 %v2192_v60, %v645_v54  ;;  %788 = vmatpush1.msra.mxu1 %v711_v3  ;;  %v653_v60 = vmul.f32 %v2194_v61, %v649_v62  ;;  %v696_v61 = vld [vmem:[#allocation12 + $0x68] sm:$0xff]  ;;  %v1120_v54 = vld [vmem:[#allocation15 + $0x78] sm:$0xff]  ;;  %v1109_v3 = vld [vmem:[#allocation15 + $0x20] sm:$0xff] }
 0x3df   : > { %789 = vmatprep.subr.mxu1 %v708_v5  ;;  %934 = vmatprep.subr.mxu0 %v696_v61  ;;  %v1114_v62 = vld [vmem:[#allocation15 + $0x48] sm:$0xff]  ;;  %v1107_v5 = vld [vmem:[#allocation15 + $0x10] sm:$0xff] }
 0x3e0   : > { %658 = vperm.xlu0 %1596, %v652_v59   ;;  %790 = vmatpush1.msra.mxu1 %v707_v52  ;;  %v1115_v59 = vld [vmem:[#allocation15 + $0x50] sm:$0xff]  ;;  %v1902_v52 = vmov 1983009808  }
 0x3e1   : > { %791 = vmatprep.subr.mxu1 %v704_v8  ;;  %935 = vmatpush1.msra.mxu0 %v695_v16  ;;  %v1056_v7 = vunpack.c.l.s4 %v1902_v52 }
 0x3e2   : > { %792 = vmatpush1.msra.mxu1 %v703_v10  ;;  %936 = vmatprep.subr.mxu0 %v692_v19 }
 0x3e3   : > { %793 = vmatprep.subr.mxu1 %v700_v12  ;;  %937 = vmatpush1.msra.mxu0 %v691_v21  ;;  %v1057_v8 = vunpack.c.0.s8 %v1056_v7  ;;  %v1052_v12 = vld [vmem:[%s2128_s3] sm:$0xff]  ;;  %s1812_s3 = sshll.u32 %s1903_s13, 4  ;;  %s1813_s3 = int_to_ptr.vmem [resolvable:$false] %s1812_s3 }
 0x3e4   : > { %663 = vperm.xlu0 %1596, %v653_v60   ;;  %794 = vmatpush1.msra.mxu1 %v699_v14  ;;  %v1105_v60 = vld [vmem:[#allocation15] sm:$0xff]  ;;  %v1054_v19 = vcombine.high %v1052_v12, %v1052_v12  ;;  %s1814_s15 = scalar_lea.vmem %s1813_s3, 64  ;;  %p1815_p5 = scmp.lt.s32.totalorder %s1214_s21, %s1813_s3 }
 0x3e5   : > { %1005 = vmatprep.subr.mxu1 %v698_v15  ;;  %828 = vmatmul.mubr.f32.vlgmr.msra.gmra.mxu1 %v2169_v18  ;;  %v654_v18 = vld [vmem:[#allocation7] sm:$0xff]  ;;  %v1060_v9 = vsub.s32 %v1057_v8, %v2174_v23  ;;  %p1816_p8 = scmp.lt.s32.totalorder %s1814_s15, %s1808_s28 }
 0x3e6   : > { %1006 = vmatpush1.msra.mxu1 %v697_v17  ;;  %938 = vmatprep.subr.mxu0 %v688_v24 }
 0x3e7   : > { %1007 = vmatprep.subr.mxu1 %v694_v20  ;;  %939 = vmatpush1.msra.mxu0 %v687_v26  ;;  %v1061_v13 = vrot.slane %v1052_v12, %v1060_v9  ;;  %v1068_v26 = vrot.slane %v1054_v19, %v1060_v9  ;;  %p1817_p1 = por %p1816_p8, %p1815_p5 }
 0x3e8   : > { %1008 = vmatpush1.msra.mxu1 %v693_v22  ;;  %940 = vmatprep.subr.mxu0 %v684_v29 }
 0x3e9   : > { %1009 = vmatprep.subr.mxu1 %v690_v25  ;;  %941 = vmatpush1.msra.mxu0 %v683_v31  ;;  %v1069_v17 = vcombine.high %v1061_v13, %v1061_v13  ;;  %p1818_p3 = pnand %p1817_p1, %p1811_p13 }
 0x3ea   : > { %1010 = vmatpush1.msra.mxu1 %v689_v28  ;;  %1045 = vmatprep.mubr.f32.mxu1 %v1898_v2 }
 0x3eb   : > { %1011 = vmatprep.subr.mxu1 %v686_v30  ;;  %v1070_v30 = vcombine.high %v1068_v26, %v1068_v26 }
 0x3ec   : > { %1012 = vmatpush1.msra.mxu1 %v685_v32 }
 0x3ed   : > { %1443 = vmatprep.subr.mxu1 %v1898_v2 }
 0x40c   : > { %v900_v10 = vpop.f32.mrf.mxu0 }
 0x40e   : > { %v902_v14 = vpop.f32.mrf.mxu0 }
 0x45b   : > { %v659_v33 = vpop.permute.xlu0 %658 }
 0x45c   : > { %v666_v34 = vmul.f32 %v659_v33, %v654_v18 }
 0x45e   : > { %v669_v36 = vsel %vm668_vm3, %v666_v34, 0.0 }
 0x45f   : > { %v670_v37 = vrot.slane %v669_v36, 4  ;;  %v664_v38 = vpop.permute.xlu0 %663 }
 0x460   : > { %v667_v39 = vmul.f32 %v664_v38, %v655_v35 }
 0x461   : > { %v671_v40 = vadd.f32 %v670_v37, %v669_v36 }
 0x462   : > { %v676_v41 = vsel %vm668_vm3, %v667_v39, 0.0 }
 0x463   : > { %v672_v42 = vrot.slane %v671_v40, 2  ;;  %v677_v43 = vrot.slane %v676_v41, 4 }
 0x465   : > { %v673_v44 = vadd.f32 %v672_v42, %v671_v40  ;;  %v678_v45 = vadd.f32 %v677_v43, %v676_v41  ;;  %v443_v40 = vld [vmem:[#allocation3] sm:$0x3] }
 0x467   : > { %v679_v46 = vrot.slane %v678_v45, 2  ;;  %v674_v47 = vrot.slane %v673_v44, 1 }
 0x469   : > { %v680_v48 = vadd.f32 %v679_v46, %v678_v45  ;;  %v675_v50 = vadd.f32 %v674_v47, %v673_v44 }
 0x46b   : > { %v681_v49 = vrot.slane %v680_v48, 1 }
 0x46d   : > { %v682_v51 = vadd.f32 %v681_v49, %v680_v48 }
 0x46f   : > { %v907_v53 = vsel %vm594_vm1, %v682_v51, %v675_v50  ;;  %v1368_v50 = vld [vmem:[%s2287_s8] ss:$0 sm:$0xff] }
 0x470   : > { %1363 = vmatmul.mubr.msk.f32.vlgmr.msra.gmra.mxu0 %vm668_vm3, %v907_v53  ;;  %1364 = vmatmul.mubr.msk.f32.vlgmr.msra.gmra.mxu1 %vm668_vm3, %v907_v53 }
 0x471   : > { %1475 = vmatprep.mubr.msk.f32.mxu1 %vm1899_vm0, %v1898_v2  ;;  %1444 = vmatpush3.msra.mxu1 %v1120_v54 }
 0x472   : > { %1445 = vmatprep.subr.mxu1 %v1898_v2 }
 0x473   : > { %1446 = vmatpush3.msra.mxu1 %v1119_v55 }
 0x474   : > { %1447 = vmatprep.subr.mxu1 %v1898_v2 }
 0x475   : > { %1448 = vmatpush3.msra.mxu1 %v1118_v56 }
 0x476   : > { %1449 = vmatprep.subr.mxu1 %v1898_v2 }
 0x477   : > { %1450 = vmatpush3.msra.mxu1 %v1117_v57 }
 0x478   : > { %1451 = vmatprep.subr.mxu1 %v1898_v2 }
 0x479   : > { %1452 = vmatpush3.msra.mxu1 %v1116_v58 }
 0x47a   : > { %1453 = vmatprep.subr.mxu1 %v1898_v2 }
 0x47b   : > { %1454 = vmatpush3.msra.mxu1 %v1115_v59 }
 0x47c   : > { %1455 = vmatprep.subr.mxu1 %v1898_v2 }
 0x47d   : > { %1456 = vmatpush3.msra.mxu1 %v1114_v62 }
 0x47e   : > { %1457 = vmatprep.subr.mxu1 %v1898_v2 }
 0x47f   : > { %1458 = vmatpush3.msra.mxu1 %v1113_v63 }
 0x480   : > { %1459 = vmatprep.subr.mxu1 %v1898_v2 }
 0x481   : > { %1460 = vmatpush3.msra.mxu1 %v1112_v0 }
 0x482   : > { %1461 = vmatprep.subr.mxu1 %v1898_v2 }
 0x483   : > { %1462 = vmatpush3.msra.mxu1 %v1111_v27 }
 0x484   : > { %1463 = vmatprep.subr.mxu1 %v1898_v2 }
 0x485   : > { %1464 = vmatpush3.msra.mxu1 %v1110_v1 }
 0x486   : > { %1465 = vmatprep.subr.mxu1 %v1898_v2 }
 0x487   : > { %1466 = vmatpush3.msra.mxu1 %v1109_v3 }
 0x488   : > { %1467 = vmatprep.subr.mxu1 %v1898_v2 }
 0x489   : > { %1468 = vmatpush3.msra.mxu1 %v1108_v4 }
 0x48a   : > { %1469 = vmatprep.subr.mxu1 %v1898_v2 }
 0x48b   : > { %1470 = vmatpush3.msra.mxu1 %v1107_v5 }
 0x48c   : > { %1471 = vmatprep.subr.mxu1 %v1898_v2 }
 0x48d   : > { %1472 = vmatpush3.msra.mxu1 %v1106_v6 }
 0x48e   : > { %1473 = vmatprep.subr.mxu1 %v1898_v2 }
 0x48f   : > { %1474 = vmatpush3.msra.mxu1 %v1105_v60 }
 0x4a5   : > { %v829_v11 = vpop.f32.mrf.mxu1 }
 0x4a7   : > { %v831_v61 = vpop.f32.mrf.mxu1 }
 0x530   : > { %v976_v15 = vpop.f32.mrf.mxu0  ;;  %v1047_v22 = vpop.f32.mrf.mxu1 }
 0x531   : > { %v977_v16 = vadd.f32 %v976_v15, %v829_v11  ;;  %v1048_v32 = vadd.f32 %v1047_v22, %v900_v10 }
 0x532   : > { %v978_v20 = vpop.f32.mrf.mxu0  ;;  %v1049_v23 = vpop.f32.mrf.mxu1 }
 0x533   : > { %v1075_v21 = vadd.f32 %v1061_v13, %v977_v16  ;;  %v979_v2 = vadd.f32 %v978_v20, %v831_v61  ;;  %v1050_v29 = vadd.f32 %v1049_v23, %v902_v14  ;;  %v1077_v34 = vadd.f32 %v1068_v26, %v1048_v32 }
 0x535   : > { %v1365_v24 = vmul.f32 -1.442695, %v1075_v21  ;;  %v1076_v25 = vadd.f32 %v1069_v17, %v979_v2  ;;  %v1078_v31 = vadd.f32 %v1070_v30, %v1050_v29 }
 0x537   : > { %1608 = vpow2.f32 %v1365_v24  ;;  %v1366_v28 = vmul.f32 -1.442695, %v1076_v25  ;;  %v1367_v18 = vmul.f32 -1.442695, %v1078_v31 }
 0x539   : > { %1610 = vpow2.f32 %v1366_v28 }
 0x53a   : > { %1612 = vpow2.f32 %v1367_v18 }
 0x544   : > { %v1609_v33 = vpop.eup %1608 }
 0x545   : > { %v1082_v35 = vadd.f32 1.0, %v1609_v33 }
 0x546   : > { %v1611_v36 = vpop.eup %1610 }
 0x547   : > { %1614 = vrcp.f32 %v1082_v35  ;;  %v1088_v37 = vadd.f32 1.0, %v1611_v36  ;;  %v1613_v38 = vpop.eup %1612 }
 0x548   : > { %1616 = vtanh.f32 %v1077_v34  ;;  %v1095_v43 = vadd.f32 1.0, %v1613_v38 }
 0x549   : > { %1618 = vrcp.f32 %v1088_v37 }
 0x54a   : > { %1620 = vrcp.f32 %v1095_v43 }
 0x554   : > { %v1615_v39 = vpop.eup %1614 }
 0x555   : > { %v1617_v41 = vpop.eup %1616 }
 0x556   : > { %v1619_v42 = vpop.eup %1618  ;;  %v1099_v44 = vmul.f32 %v1617_v41, %v1615_v39 }
 0x557   : > { %v1098_v45 = vmul.f32 %v1619_v42, %v443_v40  ;;  %v1621_v47 = vpop.eup %1620 }
 0x559   : > { %v1100_v46 = vadd.f32 %v1099_v44, %v1098_v45 }
 0x55b   : > { %1104 = vst [vmem:[#allocation3] sm:$0x3] %v1100_v46  ;;  %1622 = vtanh.f32 %v1100_v46 }
 0x568   : > { %v1623_v48 = vpop.eup %1622 }
 0x569   : > { %v1102_v49 = vmul.f32 %v1623_v48, %v1621_v47 }
 0x56b   : > { %1103 = vst [vmem:[#allocation2] sm:$0x3] %v1102_v49  ;;  %1476 = vmatmul.mubr.f32.vlgmr.msra.gmra.mxu1 %v1102_v49 }
 0x62b   : > { %v1194_v51 = vpop.f32.mrf.mxu1 }
 0x62c   : > { %v1195_v53 = vadd.f32 %v1368_v50, %v1194_v51 }
 0x62d   : > { %v1477_v54 = vpop.f32.mrf.mxu1 }
 0x62e   : > { %1198 = vst [vmem:[%s2147_s5] sm:$0x3] %v1195_v53 }
 0x62f   : > { %1821 = shalt.err (!%p1818_p3)
}
 0x630   : > { %s1822_s1 = scalar_lea.hbm %s2242_s18, 32  ;;  %s1826_s16 = scalar_lea.hbm %s2288_s9, 256 }
 0x631   : > { %p1823_p4 = scmp.ne.s32.totalorder %s2242_s18, %s1822_s1  ;;  %p1827_p0 = scmp.lt.s32.totalorder %s2242_s18, %s2288_s9 }
 0x632   : > { %p1828_p7 = scmp.lt.s32.totalorder %s1826_s16, %s1822_s1 }
 0x633   : > { %p1824_p6 = pnand %p1823_p4, %p2318_p9 }
 0x634   : > { %p1829_p2 = por %p1828_p7, %p1827_p0 }
 0x635   : > { %p1825_p12 = pneg %p1824_p6 }
 0x637   : > { %p1830_p10 = pnand %p1829_p2, %p1825_p12 }
 0x639   : > { %1833 = shalt.err (!%p1830_p10)
}
 0x63a   : > { %1504 = dma.vmem_to_hbm [thread:$0]  (%p2318_p9), %s1214_s21, 32, %s2242_s18, %s1200_s25  }
 0x63b PF: > { %p1546_p11 = scmp.ge.s32.totalorder %s1884_s12, 2  ;;  %s1225_s20 = sand.u32 1, %s1872_s30  }
 0x63c   : > { %p2319_p13 = scmp.ne.s32.totalorder %s2307_s26, 0  ;;  %s1226_s29 = scalar_lea.sflag [#allocation6], %s1225_s20 }
 0x63e   : > { %p1530_p5 = pnand %p1546_p11, %p2319_p13 }
 0x640   : > { %p1531_p8 = pneg %p1530_p5 }
 0x642   : > { %1867 = dma.done.wait (%p1531_p8), %s1226_s29, 32  }
 0x643   : > { %1869 = vsyncadd (%p1531_p8), %s1226_s29, 4294967264  ;;  %p25_p1 = scmp.ge.s32.totalorder %s2061_s22, 10   ;;  %s2320_s30 = smov %s1876_s10 }
 0x644   : > { %s2321_s10 = smov %s1880_s11  ;;  %s2322_s11 = smov %s2072_s14 }
 0x645   : > { %s2323_s12 = smov %s2061_s22  ;;  %27 = sbr.rel (!%p25_p1) target bundleno = 13 (0xd), region = 129 }
 0x64a   :  { %1231 = vsyncpa [#allocation5], 1 }
 0x64b   :  { %1233 = vsyncpa [#allocation5 + $0x1], 1 }
 0x64c   :  { %1234 = vsyncpa [#allocation8], 1 }
 0x64d   :  { %1235 = vsyncpa [#allocation11], 1 }
 0x64e   :  { %1236 = vsyncpa [#allocation14], 1 }
 0x64f   :  { %1237 = vsyncpa [#allocation6], 1 }
 0x650   :  { %1239 = vsyncpa [#allocation6 + $0x1], 1 }

</bundles_post_ra>
